<compile_context>
chip_gen: v7x
topology: tpu7x:2x2x1
jax: 0.10.0
libtpu: 0.0.40
codegen_flags: <defaults>
</compile_context>

<pallas_src>
import jax
import jax.numpy as jnp
from jax.experimental import pallas as pl
from jax.experimental.pallas import tpu as pltpu


def _gelu_exact(x):
    # Exact (erf-based) GELU, matching torch.nn.GELU() default.
    return 0.5 * x * (1.0 + jax.lax.erf(x * 0.7071067811865476))


def _round_up(x, n):
    return ((x + n - 1) // n) * n


def feedforward_kernel(x_ref, w1_ref, b1_ref, w2_ref, b2_ref, o_ref):
    # x_ref : (TM, dim)       VMEM  (bf16, streamed per grid step)
    # w1_ref: (dim, hidden)   VMEM  (bf16, resident across grid)
    # b1_ref: (1, hidden)     VMEM  (f32,  resident)
    # w2_ref: (hidden, dim)   VMEM  (bf16, resident)
    # b2_ref: (1, dim)        VMEM  (f32,  resident)
    # o_ref : (TM, dim)       VMEM  (f32,  streamed per grid step)

    # First linear on the MXU (bf16 inputs, f32 accumulate), then bias + exact
    # GELU in f32 on the VPU/EUP.
    h = jnp.dot(x_ref[...], w1_ref[...], preferred_element_type=jnp.float32)
    h = _gelu_exact(h + b1_ref[...])

    # Dropout(p=0.0) is identity.

    # Second linear: cast activations back to bf16 for the MXU, f32 accumulate.
    y = jnp.dot(h.astype(w2_ref.dtype), w2_ref[...],
                preferred_element_type=jnp.float32)
    y = y + b2_ref[...]

    o_ref[...] = y.astype(o_ref.dtype)


def feedforward(x, w1, b1, w2, b2, *, block_m=256, compute_dtype=jnp.bfloat16):
    """x: (batch, seq, dim) -> (batch, seq, dim)."""
    batch, seq, dim = x.shape
    hidden = w1.shape[1]
    m = batch * seq

    # Flatten rows; MXU operands in bf16, f32 accumulation inside the kernel.
    x2d = x.reshape(m, dim).astype(compute_dtype)
    w1c = w1.astype(compute_dtype)
    w2c = w2.astype(compute_dtype)
    b1_2d = b1.reshape(1, hidden).astype(jnp.float32)
    b2_2d = b2.reshape(1, dim).astype(jnp.float32)

    # Row tile: large enough to amortize per-grid-step overhead, small enough
    # that resident weights + (TM, hidden) f32 intermediate fit scoped VMEM on
    # every generation (incl. v7x's 64 MiB physical ceiling).
    tm = min(block_m, _round_up(m, 8))
    m_pad = _round_up(m, tm)
    if m_pad != m:
        x2d = jnp.pad(x2d, ((0, m_pad - m), (0, 0)))
    grid = (m_pad // tm,)

    c_item = jnp.dtype(compute_dtype).itemsize
    o_item = jnp.dtype(x.dtype).itemsize
    vmem_bytes = (
        2 * (dim * hidden) * c_item          # resident w1 + w2
        + (hidden + dim) * 4                 # resident biases (f32)
        + 2 * tm * dim * c_item              # double-buffered x tiles
        + 2 * tm * dim * o_item              # double-buffered out tiles
        + tm * hidden * 4 + tm * dim * 4     # in-kernel f32 intermediates
    )
    vmem_limit = int(min(100 * 2**20, max(2 * vmem_bytes, 16 * 2**20)))

    cost = pl.CostEstimate(
        flops=2 * 2 * m_pad * dim * hidden,          # two matmuls
        transcendentals=m_pad * hidden,              # erf per hidden element
        bytes_accessed=(m_pad * dim * (c_item + o_item)
                        + 2 * dim * hidden * c_item
                        + (hidden + dim) * 4),
    )

    out2d = pl.pallas_call(
        feedforward_kernel,
        out_shape=jax.ShapeDtypeStruct((m_pad, dim), x.dtype),
        grid=grid,
        in_specs=[
            pl.BlockSpec((tm, dim), lambda i: (i, 0)),        # x: streamed
            pl.BlockSpec((dim, hidden), lambda i: (0, 0)),    # w1: resident
            pl.BlockSpec((1, hidden), lambda i: (0, 0)),      # b1: resident
            pl.BlockSpec((hidden, dim), lambda i: (0, 0)),    # w2: resident
            pl.BlockSpec((1, dim), lambda i: (0, 0)),         # b2: resident
        ],
        out_specs=pl.BlockSpec((tm, dim), lambda i: (i, 0)),
        compiler_params=pltpu.CompilerParams(
            dimension_semantics=("parallel",),
            vmem_limit_bytes=vmem_limit,
        ),
        cost_estimate=cost,
    )(x2d, w1c, b1_2d, w2c, b2_2d)

    return out2d[:m].reshape(batch, seq, dim)


def feedforward_ref(x, w1, b1, w2, b2):
    """Pure-JAX f32 reference matching the PyTorch module."""
    h = jnp.einsum("bsd,dh->bsh", x, w1) + b1
    h = _gelu_exact(h)
    y = jnp.einsum("bsh,hd->bsd", h, w2) + b2
    return y


if __name__ == "__main__":
    # Small shapes consistent with the module: (batch, seq, dim), hidden_dim.
    batch, seq, dim, hidden_dim = 2, 8, 32, 64

    key = jax.random.PRNGKey(0)
    kx, kw1, kb1, kw2, kb2 = jax.random.split(key, 5)

    x = jax.random.normal(kx, (batch, seq, dim), dtype=jnp.float32)

    # Deterministic parameter init (PyTorch-Linear-like uniform scaling).
    lim1 = 1.0 / jnp.sqrt(dim)
    lim2 = 1.0 / jnp.sqrt(hidden_dim)
    w1 = jax.random.uniform(kw1, (dim, hidden_dim), jnp.float32, -lim1, lim1)
    b1 = jax.random.uniform(kb1, (hidden_dim,), jnp.float32, -lim1, lim1)
    w2 = jax.random.uniform(kw2, (hidden_dim, dim), jnp.float32, -lim2, lim2)
    b2 = jax.random.uniform(kb2, (dim,), jnp.float32, -lim2, lim2)

    out = feedforward(x, w1, b1, w2, b2)
    jax.block_until_ready(out)

    ref = feedforward_ref(x, w1, b1, w2, b2)
    assert out.shape == (batch, seq, dim)
    # bf16 MXU inputs with f32 accumulate -> relaxed tolerance vs f32 reference.
    assert jnp.allclose(out, ref, atol=5e-2, rtol=5e-2), "mismatch vs reference"

    print("KERNEL_OK")
</pallas_src>

<mosaic_0001>
module attributes {stable_mosaic.version = 11 : i64} {
  func.func @feedforward_kernel(%arg0: i32, %arg1: memref<16x32xbf16, #tpu.memory_space<vmem>>, %arg2: memref<32x64xbf16, #tpu.memory_space<vmem>>, %arg3: memref<1x64xf32, #tpu.memory_space<vmem>>, %arg4: memref<64x32xbf16, #tpu.memory_space<vmem>>, %arg5: memref<1x32xf32, #tpu.memory_space<vmem>>, %arg6: memref<16x32xf32, #tpu.memory_space<vmem>>) attributes {dimension_semantics = [#tpu.dimension_semantics<parallel>], iteration_bounds = array<i64: 1>, scalar_prefetch = 0 : i64, scratch_operands = 0 : i64, tpu.core_type = #tpu.core_type<tc>, window_params = [{transform_indices = @transform_0, window_bounds = array<i64: 16, 32>}, {pipeline_mode = #tpu.pipeline_mode<synchronous>, transform_indices = @transform_1, window_bounds = array<i64: 32, 64>}, {pipeline_mode = #tpu.pipeline_mode<synchronous>, transform_indices = @transform_2, window_bounds = array<i64: 1, 64>}, {pipeline_mode = #tpu.pipeline_mode<synchronous>, transform_indices = @transform_3, window_bounds = array<i64: 64, 32>}, {pipeline_mode = #tpu.pipeline_mode<synchronous>, transform_indices = @transform_4, window_bounds = array<i64: 1, 32>}, {transform_indices = @transform_5, window_bounds = array<i64: 16, 32>}]} {
    %c0 = arith.constant 0 : index
    %c0_0 = arith.constant 0 : index
    %0 = vector.load %arg1[%c0, %c0_0] : memref<16x32xbf16, #tpu.memory_space<vmem>>, vector<16x32xbf16>
    %c0_1 = arith.constant 0 : index
    %c0_2 = arith.constant 0 : index
    %1 = vector.load %arg2[%c0_1, %c0_2] : memref<32x64xbf16, #tpu.memory_space<vmem>>, vector<32x64xbf16>
    %cst = arith.constant dense<0.000000e+00> : vector<16x64xf32>
    %2 = tpu.matmul %0, %1, %cst {dimension_numbers = #tpu.dot_dimension_numbers<[1], [0], [0], [1], [0, 0, 1, 1], [], []>} : vector<16x32xbf16>, vector<32x64xbf16>, vector<16x64xf32> -> vector<16x64xf32>
    %c0_3 = arith.constant 0 : index
    %c0_4 = arith.constant 0 : index
    %3 = vector.load %arg3[%c0_3, %c0_4] : memref<1x64xf32, #tpu.memory_space<vmem>>, vector<1x64xf32>
    %4 = vector.broadcast %3 : vector<1x64xf32> to vector<16x64xf32>
    %5 = arith.addf %2, %4 : vector<16x64xf32>
    %cst_5 = arith.constant 5.000000e-01 : f32
    %6 = vector.broadcast %cst_5 : f32 to vector<16x64xf32>
    %7 = arith.mulf %6, %5 : vector<16x64xf32>
    %cst_6 = arith.constant 0.707106769 : f32
    %8 = vector.broadcast %cst_6 : f32 to vector<16x64xf32>
    %9 = arith.mulf %5, %8 : vector<16x64xf32>
    %10 = math.erf %9 : vector<16x64xf32>
    %cst_7 = arith.constant 1.000000e+00 : f32
    %11 = vector.broadcast %cst_7 : f32 to vector<16x64xf32>
    %12 = arith.addf %11, %10 : vector<16x64xf32>
    %13 = arith.mulf %7, %12 : vector<16x64xf32>
    %14 = arith.truncf %13 : vector<16x64xf32> to vector<16x64xbf16>
    %c0_8 = arith.constant 0 : index
    %c0_9 = arith.constant 0 : index
    %15 = vector.load %arg4[%c0_8, %c0_9] : memref<64x32xbf16, #tpu.memory_space<vmem>>, vector<64x32xbf16>
    %cst_10 = arith.constant dense<0.000000e+00> : vector<16x32xf32>
    %16 = tpu.matmul %14, %15, %cst_10 {dimension_numbers = #tpu.dot_dimension_numbers<[1], [0], [0], [1], [0, 0, 1, 1], [], []>} : vector<16x64xbf16>, vector<64x32xbf16>, vector<16x32xf32> -> vector<16x32xf32>
    %c0_11 = arith.constant 0 : index
    %c0_12 = arith.constant 0 : index
    %17 = vector.load %arg5[%c0_11, %c0_12] : memref<1x32xf32, #tpu.memory_space<vmem>>, vector<1x32xf32>
    %18 = vector.broadcast %17 : vector<1x32xf32> to vector<16x32xf32>
    %19 = arith.addf %16, %18 : vector<16x32xf32>
    %c0_13 = arith.constant 0 : index
    %c0_14 = arith.constant 0 : index
    %20 = vector.load %arg6[%c0_13, %c0_14] : memref<16x32xf32, #tpu.memory_space<vmem>>, vector<16x32xf32>
    tpu.vector_store %arg6[%c0_13, %c0_14], %19 {strides = array<i32>} : memref<16x32xf32, #tpu.memory_space<vmem>>, vector<16x32xf32>,
    return
  }
  func.func @transform_0(%arg0: i32) -> (i32, i32) {
    %c0_i32 = arith.constant 0 : i32
    %c0_i32_0 = arith.constant 0 : i32
    return %arg0, %c0_i32 : i32, i32
  }
  func.func @transform_1(%arg0: i32) -> (i32, i32) {
    %c0_i32 = arith.constant 0 : i32
    %c0_i32_0 = arith.constant 0 : i32
    %c0_i32_1 = arith.constant 0 : i32
    return %c0_i32, %c0_i32_0 : i32, i32
  }
  func.func @transform_2(%arg0: i32) -> (i32, i32) {
    %c0_i32 = arith.constant 0 : i32
    %c0_i32_0 = arith.constant 0 : i32
    %c0_i32_1 = arith.constant 0 : i32
    return %c0_i32, %c0_i32_0 : i32, i32
  }
  func.func @transform_3(%arg0: i32) -> (i32, i32) {
    %c0_i32 = arith.constant 0 : i32
    %c0_i32_0 = arith.constant 0 : i32
    %c0_i32_1 = arith.constant 0 : i32
    return %c0_i32, %c0_i32_0 : i32, i32
  }
  func.func @transform_4(%arg0: i32) -> (i32, i32) {
    %c0_i32 = arith.constant 0 : i32
    %c0_i32_0 = arith.constant 0 : i32
    %c0_i32_1 = arith.constant 0 : i32
    return %c0_i32, %c0_i32_0 : i32, i32
  }
  func.func @transform_5(%arg0: i32) -> (i32, i32) {
    %c0_i32 = arith.constant 0 : i32
    %c0_i32_0 = arith.constant 0 : i32
    return %arg0, %c0_i32 : i32, i32
  }
}

</mosaic_0001>

<bundles_post_ra>
// kernel: tpu_custom_call.1
= control target key start
LH: loop header
LB: loop body
LE: loop exit
PB: predicated region body
PF: predicated region fallthrough
CT: control target
= control target key end

     0   :  { %v289_v1 = vmov 0.0   ;;  %vm290_vm0 = vmmov 0   ;;  %vm52_vm1 = vcmask 261120   ;;  %s366_s0 = inlined_call_operand.vmem [shape: bf16[16,32], index: 0, kind: input, shape index: {}]   ;;  %s367_s1 = inlined_call_operand.vmem [shape: bf16[32,64], index: 1, kind: input, shape index: {}]   ;;  %s368_s2 = inlined_call_operand.vmem [shape: f32[1,64], index: 2, kind: input, shape index: {}]   ;;  %s369_s3 = inlined_call_operand.vmem [shape: bf16[64,32], index: 3, kind: input, shape index: {}]   ;;  %s370_s4 = inlined_call_operand.vmem [shape: f32[1,32], index: 4, kind: input, shape index: {}]   ;;  %s371_s5 = inlined_call_operand.hbm [shape: f32[16,32], index: 5, kind: output, shape index: {}]  }
   0x1   :  { %v254_v0 = vld [vmem:[%s367_s1] sm:$0xff]   ;;  %229 = vmatprep.subr.bf16.mxu0 %v289_v1  ;;  %237 = vmatprep.subr.bf16.mxu1 %v289_v1  ;;  %v255_v2 = vld [vmem:[%s367_s1 + $0x8] sm:$0xff]  }
   0x2   :  { %230 = vmatpush3.bf16.msra.mxu0 %v254_v0  ;;  %233 = vmatprep.mubr.msk.bf16.mxu0 %vm290_vm0, %v289_v1  ;;  %v256_v3 = vld [vmem:[%s366_s0] sm:$0xff]  }
   0x3   :  { %231 = vmatprep.subr.bf16.mxu0 %v289_v1  ;;  %245 = vmatprep.mubr.msk.bf16.mxu1 %vm290_vm0, %v289_v1 }
   0x6   :  { %232 = vmatpush3.bf16.msra.mxu0 %v255_v2 }
   0x7   :  { %10 = vsyncpa [#allocation3], 0  ;;  %v257_v4 = vld [vmem:[%s369_s3] sm:$0xff]   ;;  %v258_v5 = vld [vmem:[%s369_s3 + $0x8] sm:$0xff]   ;;  %vm147_vm2 = vcmask 523264   ;;  %s291_s7 = smov [#allocation2]  }
   0x8   :  { %238 = vmatpush3.bf16.msra.mxu1 %v257_v4  ;;  %v259_v6 = vld [vmem:[%s369_s3 + $0x10] sm:$0xff]   ;;  %v260_v7 = vld [vmem:[%s369_s3 + $0x18] sm:$0xff]   ;;  %v210_v8 = vld [vmem:[%s368_s2] ss:$0 sm:$0xff]  ;;  %s199_s8 = sshll.u32 %s291_s7, 4  ;;  %s200_s8 = int_to_ptr.vmem [resolvable:$true] %s199_s8 }
   0x9   :  { %234 = vmatmul.mubr.msk.bf16.vlgmr.msra.gmra.mrb[0].mxu0 %vm52_vm1, %v256_v3  ;;  %239 = vmatprep.subr.bf16.mxu1 %v289_v1  ;;  %v215_v26 = vld [vmem:[%s370_s4] ss:$0 sm:$0xff]  ;;  %s265_s9 = scalar_lea.vmem %s200_s8, 256  ;;  %p270_p1 = scmp.lt.s32.totalorder %s200_s8, %s200_s8 }
   0xa   :  { %p266_p0 = scmp.ne.s32.totalorder %s200_s8, %s265_s9  ;;  %p271_p2 = scmp.lt.s32.totalorder %s265_s9, %s265_s9 }
   0xc   :  { %240 = vmatpush3.bf16.msra.mxu1 %v258_v5  ;;  %p272_p3 = por %p271_p2, %p270_p1 }
   0xd   :  { %241 = vmatprep.subr.bf16.mxu1 %v289_v1 }
   0xe   :  { %p273_p4 = pnand %p272_p3, %p266_p0 }
  0x10   :  { %242 = vmatpush3.bf16.msra.mxu1 %v259_v6 }
  0x11   :  { %243 = vmatprep.subr.bf16.mxu1 %v289_v1 }
  0x14   :  { %244 = vmatpush3.bf16.msra.mxu1 %v260_v7 }
  0xdc   :  { %v90_v9 = vpop.f32.mrb[0].mxu0 }
  0xdd   :  { %v91_v10 = vadd.f32 %v210_v8, %v90_v9  ;;  %v235_v11 = vpop.f32.mrb[1].mxu0 }
  0xde   :  { %v93_v12 = vpop.f32.mrb[2].mxu0 }
  0xdf   :  { %v99_v13 = vmul.f32 0.70710677, %v91_v10  ;;  %v94_v14 = vadd.f32 %v210_v8, %v93_v12  ;;  %v236_v15 = vpop.f32.mrb[3].mxu0  ;;  %v97_v20 = vmul.f32 0.5, %v91_v10 }
  0xe1   :  { %261 = verf.f32 %v99_v13  ;;  %v100_v16 = vmul.f32 0.70710677, %v94_v14  ;;  %v98_v21 = vmul.f32 0.5, %v94_v14 }
  0xe3   :  { %263 = verf.f32 %v100_v16 }
  0xeb   :  { %v262_v17 = vpop.eup %261 }
  0xec   :  { %v103_v18 = vadd.f32 1.0, %v262_v17 }
  0xed   :  { %v264_v19 = vpop.eup %263 }
  0xee   :  { %v104_v22 = vadd.f32 1.0, %v264_v19  ;;  %v105_v23 = vmul.f32 %v103_v18, %v97_v20 }
  0xf0   :  { %v106_v24 = vmul.f32 %v104_v22, %v98_v21 }
  0xf2   :  { %v107_v25 = vpack.c.bf16 %v106_v24, %v105_v23 }
  0xf4   :  { %246 = vmatmul.mubr.msk.bf16.vlgmr.msra.gmra.mrb[0].mxu1 %vm147_vm2, %v107_v25 }
 0x1c7   :  { %v185_v27 = vpop.f32.mrb[0].mxu1 }
 0x1c8   :  { %v186_v28 = vadd.f32 %v215_v26, %v185_v27  ;;  %v247_v29 = vpop.f32.mrb[1].mxu1 }
 0x1c9   :  { %v188_v30 = vpop.f32.mrb[2].mxu1 }
 0x1ca   :  { %192 = vst.msk [vmem:[#allocation2] sm:$0xff] %vm52_vm1, %v186_v28  ;;  %v189_v31 = vadd.f32 %v215_v26, %v188_v30  ;;  %v248_v32 = vpop.f32.mrb[3].mxu1 }
 0x1cc   :  { %193 = vst.msk [vmem:[#allocation2 + $0x8] sm:$0xff] %vm52_vm1, %v189_v31 }
 0x1cd   :  { %276 = shalt.err (!%p273_p4)
}
 0x1ce   :  { %s277_s11 = scalar_lea.hbm %s371_s5, 256 }
 0x1cf   :  { %p278_p5 = scmp.ne.s32.totalorder %s371_s5, %s277_s11  ;;  %p281_p6 = scmp.lt.u32.totalorder %s277_s11, %s371_s5 }
 0x1d1   :  { %p283_p7 = pnand %p281_p6, %p278_p5 }
 0x1d3   :  { %286 = shalt.err (!%p283_p7)
}
 0x1d4   :  { %s292_s16 = smov 128   ;;  %s293_s17 = smov 8  }
 0x1d5   :  { %205 = dma.vmem_to_hbm [thread:$0]  %s200_s8, 256, %s371_s5, [#allocation3], %s292_s16, %s292_s16, %s293_s17  }
 0x1d6   :  { %287 = dma.done.wait [#allocation3], 256  }
 0x1d7   :  { %288 = vsyncadd [#allocation3], 4294967040 }
 0x1d8   :  { %209 = vsyncpa [#allocation3], 1 }

</bundles_post_ra>
